<compile_context>
chip_gen: v6e
topology: v6e:2x2x1
jax: 0.10.0
libtpu: 0.0.40
codegen_flags: <defaults>
</compile_context>

<pallas_src>
import functools

import jax
import jax.numpy as jnp
from jax.experimental import pallas as pl
from jax.experimental.pallas import tpu as pltpu


def _round_up(x, m):
    return (x + m - 1) // m * m


def _embed_kernel(patches_ref, w_ref, pos_ref, out_ref):
    # patches_ref: (TN, K)  one tile of flattened patches
    # w_ref:       (K, D)   full matmul weight, VMEM-resident across the grid
    # pos_ref:     (TN, D)  position-embedding tile (conv bias already folded)
    # out_ref:     (TN, D)
    y = jnp.dot(patches_ref[...], w_ref[...],
                preferred_element_type=jnp.float32)      # MXU, f32 accumulate
    y = y + pos_ref[...].astype(jnp.float32)             # f32 epilogue (VPU)
    out_ref[...] = y.astype(out_ref.dtype)


def siglip_vision_embeddings(pixel_values, conv_weight, conv_bias,
                             pos_embedding, patch_size, *,
                             compute_dtype=None, tile_n=256):
    """pixel_values: (B, C, H, W) float (NCHW, PyTorch convention).
    conv_weight: (D, C, P, P)  (nn.Conv2d layout)
    conv_bias:   (D,)
    pos_embedding: (N, D) with N = (H // P) * (W // P)
    compute_dtype: optional dtype (e.g. jnp.bfloat16) for the patch / weight /
      pos streams; the matmul accumulates in f32 and the pos/bias add is f32.
    returns: (B, N, D) in pixel_values.dtype
    """
    B, C, H, W = pixel_values.shape
    P = patch_size
    D = conv_weight.shape[0]
    nH, nW = H // P, W // P
    N = nH * nW
    K = C * P * P
    out_dtype = pixel_values.dtype

    # ---- tiling along the patch axis (no padding anywhere) ----
    row_align = 8
    if compute_dtype is not None and jnp.dtype(compute_dtype).itemsize < 4:
        row_align = 32 // jnp.dtype(compute_dtype).itemsize   # bf16 -> 16
    if N <= tile_n:
        TN = N                      # full-dim block: legal even if N % 8 != 0
    else:
        TN = _round_up(tile_n, row_align)
    n_tiles = pl.cdiv(N, TN)
    # v7x has 2 TensorCores per chip: guarantee >= 2 parallel grid programs
    # even at batch=1 so a core is not left idle.
    if B * n_tiles < 2 and N >= 2 * row_align:
        TN = _round_up(pl.cdiv(N, 2), row_align)
        n_tiles = pl.cdiv(N, TN)

    # ---- glue: extract non-overlapping patches in (C, kH, kW) order ----
    # (done wrapper-side; allow_input_fusion lets XLA pull it into the kernel
    # input when possible)
    x = pixel_values
    if compute_dtype is not None:
        x = x.astype(compute_dtype)             # cast first: transpose moves half the bytes
    x = x.reshape(B, C, nH, P, nW, P)
    x = jnp.transpose(x, (0, 2, 4, 1, 3, 5))    # (B, nH, nW, C, P, P)
    patches = x.reshape(B, N, K)

    # Conv2d weight (D, C, P, P) -> matmul weight (K, D)
    w = conv_weight.reshape(D, K).T
    if compute_dtype is not None:
        w = w.astype(compute_dtype)

    # Fold the conv bias into the position table (removes one input stream).
    pos_plus_bias = (pos_embedding.astype(jnp.float32)
                     + conv_bias.astype(jnp.float32)[None, :])
    if compute_dtype is not None:
        pos_plus_bias = pos_plus_bias.astype(compute_dtype)

    cost = pl.CostEstimate(
        flops=2 * B * N * K * D,
        transcendentals=0,
        # Each stream is read/written exactly once (pos/weight are not
        # re-streamed per batch element thanks to the grid ordering).
        bytes_accessed=(patches.size * patches.dtype.itemsize
                        + w.size * w.dtype.itemsize
                        + pos_plus_bias.size * pos_plus_bias.dtype.itemsize
                        + B * N * D * jnp.dtype(out_dtype).itemsize),
    )

    out = pl.pallas_call(
        _embed_kernel,
        out_shape=jax.ShapeDtypeStruct((B, N, D), out_dtype),
        grid_spec=pltpu.PrefetchScalarGridSpec(
            num_scalar_prefetch=0,
            # B innermost: pos / weight block indices are constant across
            # consecutive steps -> their DMA is skipped (streamed once total).
            grid=(n_tiles, B),
            in_specs=[
                pl.BlockSpec((pl.Squeezed(), TN, K), lambda n, b: (b, n, 0)),
                pl.BlockSpec((K, D), lambda n, b: (0, 0)),   # VMEM-resident
                pl.BlockSpec((TN, D), lambda n, b: (n, 0)),
            ],
            out_specs=pl.BlockSpec((pl.Squeezed(), TN, D),
                                   lambda n, b: (b, n, 0)),
        ),
        compiler_params=pltpu.CompilerParams(
            dimension_semantics=("parallel", "parallel"),
            vmem_limit_bytes=48 * 1024 * 1024,
            # Let XLA fuse the patch-extraction transpose into the patches
            # operand (no pad in the chain anymore to block it).
            allow_input_fusion=[True, False, False],
        ),
        cost_estimate=cost,
    )(patches, w, pos_plus_bias)
    return out


if __name__ == "__main__":
    # Small config consistent with the module:
    #   num_channels=4, image_size=16, patch_size=4, hidden_size=32
    # -> num_patches = (16 // 4) ** 2 = 16
    B, C, IMG, PATCH, HID = 2, 4, 16, 4, 32
    N = (IMG // PATCH) ** 2

    key = jax.random.PRNGKey(0)
    k_px, k_w, k_b, k_pos = jax.random.split(key, 4)

    pixel_values = jax.random.normal(k_px, (B, C, IMG, IMG), dtype=jnp.float32)
    conv_weight = jax.random.normal(k_w, (HID, C, PATCH, PATCH),
                                    dtype=jnp.float32) * 0.02
    conv_bias = jax.random.normal(k_b, (HID,), dtype=jnp.float32) * 0.02
    pos_embedding = jax.random.normal(k_pos, (N, HID), dtype=jnp.float32) * 0.02

    # Pure-JAX reference (same math as the PyTorch forward).
    ref = jax.lax.conv_general_dilated(
        pixel_values, conv_weight,
        window_strides=(PATCH, PATCH), padding="VALID",
        dimension_numbers=("NCHW", "OIHW", "NCHW"),
    ) + conv_bias[None, :, None, None]
    ref = ref.reshape(B, HID, N).transpose(0, 2, 1) + pos_embedding[None]

    # f32 path (exact match to the PyTorch math)
    fwd_f32 = jax.jit(functools.partial(siglip_vision_embeddings,
                                        patch_size=PATCH))
    out = jax.block_until_ready(
        fwd_f32(pixel_values, conv_weight, conv_bias, pos_embedding))
    assert out.shape == (B, N, HID), out.shape
    assert jnp.allclose(out, ref, atol=1e-4, rtol=1e-4), \
        float(jnp.max(jnp.abs(out - ref)))

    # bf16-stream path (halves HBM read traffic; f32 MXU accumulation).
    fwd_bf16 = jax.jit(functools.partial(siglip_vision_embeddings,
                                         patch_size=PATCH,
                                         compute_dtype=jnp.bfloat16))
    out_bf16 = jax.block_until_ready(
        fwd_bf16(pixel_values, conv_weight, conv_bias, pos_embedding))
    assert out_bf16.shape == (B, N, HID), out_bf16.shape
    assert jnp.allclose(out_bf16, ref, atol=2e-2, rtol=2e-2), \
        float(jnp.max(jnp.abs(out_bf16 - ref)))

    print("KERNEL_OK")
</pallas_src>

<mosaic_0001>
module attributes {stable_mosaic.version = 11 : i64} {
  func.func @_embed_kernel(%arg0: i32, %arg1: i32, %arg2: memref<1x16x64xf32, #tpu.memory_space<vmem>>, %arg3: memref<64x32xf32, #tpu.memory_space<vmem>>, %arg4: memref<16x32xf32, #tpu.memory_space<vmem>>, %arg5: memref<1x16x32xf32, #tpu.memory_space<vmem>>) attributes {dimension_semantics = [#tpu.dimension_semantics<parallel>, #tpu.dimension_semantics<parallel>], iteration_bounds = array<i64: 1, 2>, scalar_prefetch = 0 : i64, scratch_operands = 0 : i64, tpu.core_type = #tpu.core_type<tc>, window_params = [{transform_indices = @transform_0, window_bounds = array<i64: 1, 16, 64>}, {pipeline_mode = #tpu.pipeline_mode<synchronous>, transform_indices = @transform_1, window_bounds = array<i64: 64, 32>}, {transform_indices = @transform_2, window_bounds = array<i64: 16, 32>}, {transform_indices = @transform_3, window_bounds = array<i64: 1, 16, 32>}]} {
    %c0 = arith.constant 0 : index
    %c0_0 = arith.constant 0 : index
    %c0_1 = arith.constant 0 : index
    %0 = vector.load %arg2[%c0, %c0_0, %c0_1] : memref<1x16x64xf32, #tpu.memory_space<vmem>>, vector<1x16x64xf32>
    %1 = vector.shape_cast %0 : vector<1x16x64xf32> to vector<16x64xf32>
    %c0_2 = arith.constant 0 : index
    %c0_3 = arith.constant 0 : index
    %2 = vector.load %arg3[%c0_2, %c0_3] : memref<64x32xf32, #tpu.memory_space<vmem>>, vector<64x32xf32>
    %cst = arith.constant dense<0.000000e+00> : vector<16x32xf32>
    %3 = tpu.matmul %1, %2, %cst {dimension_numbers = #tpu.dot_dimension_numbers<[1], [0], [0], [1], [0, 0, 1, 1], [], []>} : vector<16x64xf32>, vector<64x32xf32>, vector<16x32xf32> -> vector<16x32xf32>
    %c0_4 = arith.constant 0 : index
    %c0_5 = arith.constant 0 : index
    %4 = vector.load %arg4[%c0_4, %c0_5] : memref<16x32xf32, #tpu.memory_space<vmem>>, vector<16x32xf32>
    %5 = arith.addf %3, %4 : vector<16x32xf32>
    %c0_6 = arith.constant 0 : index
    %c0_7 = arith.constant 0 : index
    %c0_8 = arith.constant 0 : index
    %6 = vector.load %arg5[%c0_6, %c0_7, %c0_8] : memref<1x16x32xf32, #tpu.memory_space<vmem>>, vector<1x16x32xf32>
    %7 = vector.shape_cast %6 : vector<1x16x32xf32> to vector<16x32xf32>
    %8 = vector.shape_cast %5 : vector<16x32xf32> to vector<1x16x32xf32>
    tpu.vector_store %arg5[%c0_6, %c0_7, %c0_8], %8 {strides = array<i32>} : memref<1x16x32xf32, #tpu.memory_space<vmem>>, vector<1x16x32xf32>,
    return
  }
  func.func @transform_0(%arg0: i32, %arg1: i32) -> (i32, i32, i32) {
    %c0_i32 = arith.constant 0 : i32
    %c0_i32_0 = arith.constant 0 : i32
    return %arg1, %arg0, %c0_i32 : i32, i32, i32
  }
  func.func @transform_1(%arg0: i32, %arg1: i32) -> (i32, i32) {
    %c0_i32 = arith.constant 0 : i32
    %c0_i32_0 = arith.constant 0 : i32
    %c0_i32_1 = arith.constant 0 : i32
    return %c0_i32, %c0_i32_0 : i32, i32
  }
  func.func @transform_2(%arg0: i32, %arg1: i32) -> (i32, i32) {
    %c0_i32 = arith.constant 0 : i32
    %c0_i32_0 = arith.constant 0 : i32
    return %arg0, %c0_i32 : i32, i32
  }
  func.func @transform_3(%arg0: i32, %arg1: i32) -> (i32, i32, i32) {
    %c0_i32 = arith.constant 0 : i32
    %c0_i32_0 = arith.constant 0 : i32
    return %arg1, %arg0, %c0_i32 : i32, i32, i32
  }
}

</mosaic_0001>

<bundles_post_ra>
// kernel: siglip_vision_embeddings.1
= control target key start
LH: loop header
LB: loop body
LE: loop exit
PB: predicated region body
PF: predicated region fallthrough
CT: control target
= control target key end

     0   :  { %8 = vsyncpa [#allocation3], 0  ;;  %s780_s0 = inlined_call_operand.vmem [shape: f32[2,16,64], index: 0, kind: input, shape index: {}]   ;;  %s781_s1 = inlined_call_operand.vmem [shape: f32[64,32], index: 1, kind: input, shape index: {}]   ;;  %s782_s2 = inlined_call_operand.vmem [shape: f32[16,32], index: 2, kind: input, shape index: {}]   ;;  %s783_s3 = inlined_call_operand.hbm [shape: f32[2,16,32], index: 3, kind: output, shape index: {}]  }
   0x1   :  { %10 = vsyncpa [#allocation3 + $0x1], 0  ;;  %s634_s12 = smov 0   ;;  %s636_s13 = smov 0  }
   0x2   :  { %s638_s14 = smov 0   ;;  %s640_s15 = smov 0  }
   0x3   :  { %s642_s16 = smov 0   ;;  %s644_s17 = smov 0  }
   0x4 LB: > { %s429_s18 = sadd.s32 4294967295, %s609_s17   ;;  %s430_s19 = sadd.s32 4294967294, %s609_s17   ;;  %s609_s17 = sphi %s644_s17, %s16_s17   ;;  %s605_s16 = sphi %s642_s16, %s790_s16   ;;  %s601_s15 = sphi %s640_s15, %s789_s15   ;;  %s597_s14 = sphi %s638_s14, %s788_s14   ;;  %s593_s13 = sphi %s636_s13, %s787_s13   ;;  %s589_s12 = sphi %s634_s12, %s786_s12  }
   0x5   : > { %s25_s20 = sadd.s32 1, %s605_s16  ;;  %s112_s21 = sadd.s32 1, %s597_s14 }
   0x6   : > { %p26_p0 = scmp.ge.s32.totalorder %s25_s20, 2  ;;  %p122_p1 = scmp.ne.s32.totalorder %s597_s14, %s593_s13 }
   0x7   : > { %p123_p2 = scmp.eq.s32.totalorder %s429_s18, 1  ;;  %p128_p3 = scmp.ne.s32.totalorder %s593_s13, %s589_s12 }
   0x8   : > { %s792_s20 = smov (%p26_p0, %s25_s20), 0  ;;  %p129_p5 = scmp.eq.s32.totalorder %s430_s19, 1 }
   0x9   : > { %p674_p4 = por %p123_p2, %p122_p1  ;;  %s107_s23 = ssub.s32 %s605_s16, %s792_s20 }
   0xa   : > { %p434_p6 = scmp.ge.s32.totalorder %s609_s17, 1  ;;  %p110_p7 = scmp.eq.s32.totalorder %s107_s23, 0 }
   0xb   : > { %p681_p8 = por %p129_p5, %p128_p3  ;;  %p172_p9 = scmp.lt.s32.totalorder %s609_s17, 3 }
   0xc   : > { %s687_s25 = scalar_select %p110_p7, %s597_s14, %s112_s21  }
   0xd   : > { %p173_p10 = pnand %p434_p6, %p172_p9 }
   0xe   : > { %p206_p11 = scmp.lt.s32.totalorder (!%p173_p10), %s601_s15, 1  ;;  %s202_s30 = sand.u32 (!%p173_p10), 1, %s593_s13  }
   0xf   : > { %176 = sbr.rel (%p173_p10) target bundleno = 248 (0xf8), region = 32  ;;  %s435_s4 = sshll.u32 (!%p173_p10), %s202_s30, 4 }
  0x10   : > { %s204_s7 = scalar_lea.vmem (!%p173_p10), [#allocation2], %s435_s4  ;;  %s446_s9 = sshll.u32 (!%p173_p10), %s601_s15, 8 }
  0x11   : > { %s733_s21 = scalar_lea.hbm (!%p173_p10), %s783_s3, %s446_s9  ;;  %s611_s26 = smov (!%p173_p10), [#allocation2]  }
  0x12   : > { %s537_s27 = sshll.u32 (!%p173_p10), %s611_s26, 4  ;;  %s538_s27 = int_to_ptr.vmem [resolvable:$false] %s537_s27 }
  0x13   : > { %s539_s28 = scalar_lea.vmem (!%p173_p10), %s538_s27, 512 }
  0x14   : > { %v231_v0 = vld [vmem:[%s781_s1 + $0x38] sm:$0xff]  ;;  %v230_v1 = vld [vmem:[%s781_s1 + $0x30] sm:$0xff]  ;;  %v229_v2 = vld [vmem:[%s781_s1 + $0x28] sm:$0xff]  ;;  %s207_s5 = scalar_select %p206_p11, %s601_s15, 1  ;;  %vm234_vm0 = vcmask 523264   ;;  %vm316_vm1 = vcmask 261120  }
  0x15   : > { %457 = vmatprep.subr.mxu0 %v231_v0  ;;  %v228_v3 = vld [vmem:[%s781_s1 + $0x20] sm:$0xff]  ;;  %v227_v4 = vld [vmem:[%s781_s1 + $0x18] sm:$0xff]  ;;  %v226_v6 = vld [vmem:[%s781_s1 + $0x10] sm:$0xff]  ;;  %s735_s15 = scalar_lea.sflag [#allocation3], %s202_s30 }
  0x16   : > { %458 = vmatpush3.msra.mxu0 %v231_v0  ;;  %s445_s8 = sshll.u32 %s207_s5, 4  ;;  %v225_v7 = vld [vmem:[%s781_s1 + $0x8] sm:$0xff]  ;;  %v224_v8 = vld [vmem:[%s781_s1] sm:$0xff] }
  0x17   : > { %459 = vmatprep.subr.mxu0 %v230_v1  ;;  %s213_s11 = scalar_lea.vmem %s780_s0, %s445_s8  ;;  %v233_v10 = vld [vmem:[%s782_s2 + $0x8] sm:$0xff]  ;;  %s335_s8 = sshll.u32 %s204_s7, 4  ;;  %v232_v12 = vld [vmem:[%s782_s2] sm:$0xff]  ;;  %s728_s8 = int_to_ptr.vmem [resolvable:$true] %s335_s8 }
  0x18   : > { %460 = vmatpush3.msra.mxu0 %v230_v1  ;;  %v222_v5 = vld [vmem:[%s213_s11] sm:$0xff]  ;;  %v223_v9 = vld [vmem:[%s213_s11 + $0x8] sm:$0xff]  ;;  %s533_s23 = scalar_lea.vmem %s728_s8, 256  ;;  %p540_p1 = scmp.lt.s32.totalorder %s728_s8, %s538_s27 }
  0x19   : > { %461 = vmatprep.subr.mxu0 %v229_v2  ;;  %473 = vmatprep.mubr.msk.f32.mxu0 %vm234_vm0, %v222_v5  ;;  %p534_p12 = scmp.ne.s32.totalorder %s728_s8, %s533_s23  ;;  %p541_p2 = scmp.lt.s32.totalorder %s539_s28, %s533_s23 }
  0x1a   : > { %462 = vmatpush3.msra.mxu0 %v229_v2 }
  0x1b   : > { %463 = vmatprep.subr.mxu0 %v228_v3  ;;  %p535_p13 = pnand %p534_p12, %p674_p4  ;;  %p542_p3 = por %p541_p2, %p540_p1 }
  0x1c   : > { %464 = vmatpush3.msra.mxu0 %v228_v3 }
  0x1d   : > { %465 = vmatprep.subr.mxu0 %v227_v4  ;;  %p536_p0 = pneg %p535_p13 }
  0x1e   : > { %466 = vmatpush3.msra.mxu0 %v227_v4 }
  0x1f   : > { %467 = vmatprep.subr.mxu0 %v226_v6  ;;  %p543_p5 = pnand %p542_p3, %p536_p0 }
  0x20   : > { %468 = vmatpush3.msra.mxu0 %v226_v6 }
  0x21   : > { %469 = vmatprep.subr.mxu0 %v225_v7 }
  0x22   : > { %470 = vmatpush3.msra.mxu0 %v225_v7 }
  0x23   : > { %471 = vmatprep.subr.mxu0 %v224_v8 }
  0x24   : > { %472 = vmatpush3.msra.mxu0 %v224_v8 }
  0x25   : > { %474 = vmatmul.mubr.msk.f32.vlgmr.msra.gmra.mxu0 %vm234_vm0, %v223_v9 }
  0xe5   : > { %v475_v11 = vpop.f32.mrf.mxu0 }
  0xe6   : > { %v313_v13 = vadd.f32 %v475_v11, %v233_v10 }
  0xe7   : > { %v307_v14 = vpop.f32.mrf.mxu0 }
  0xe8   : > { %318 = vst.msk [vmem:[%s204_s7 + $0x8] sm:$0xff] %vm316_vm1, %v313_v13  ;;  %v308_v15 = vadd.f32 %v307_v14, %v232_v12 }
  0xea   : > { %317 = vst.msk [vmem:[%s204_s7] sm:$0xff] %vm316_vm1, %v308_v15 }
  0xeb   : > { %546 = shalt.err (!%p543_p5)
}
  0xec   : > { %s547_s29 = scalar_lea.hbm %s733_s21, 256  ;;  %s551_s5 = scalar_lea.hbm %s783_s3, 512 }
  0xed   : > { %p548_p6 = scmp.ne.s32.totalorder %s733_s21, %s547_s29  ;;  %p552_p10 = scmp.lt.s32.totalorder %s733_s21, %s783_s3 }
  0xee   : > { %p553_p11 = scmp.lt.s32.totalorder %s551_s5, %s547_s29 }
  0xef   : > { %p549_p7 = pnand %p548_p6, %p674_p4 }
  0xf0   : > { %p554_p12 = por %p553_p11, %p552_p10 }
  0xf1   : > { %p550_p9 = pneg %p549_p7 }
  0xf3   : > { %p555_p13 = pnand %p554_p12, %p550_p9 }
  0xf5   : > { %558 = shalt.err (!%p555_p13)
}
  0xf6   : > { %s612_s9 = smov 128   ;;  %s613_s10 = smov 8  }
  0xf7   : > { %476 = dma.vmem_to_hbm [thread:$0]  (%p674_p4), %s728_s8, 256, %s733_s21, %s735_s15, %s612_s9, %s612_s9, %s613_s10  }
  0xf8 PF: > { %p482_p0 = scmp.ge.s32.totalorder %s609_s17, 2  ;;  %s350_s18 = sand.u32 1, %s589_s12  }
  0xf9   : > { %s351_s11 = scalar_lea.sflag [#allocation3], %s350_s18 }
  0xfa   : > { %p479_p1 = pnand %p482_p0, %p681_p8 }
  0xfc   : > { %p480_p2 = pneg %p479_p1 }
  0xfe   : > { %584 = dma.done.wait (%p480_p2), %s351_s11, 256  }
  0xff   : > { %586 = vsyncadd (%p480_p2), %s351_s11, 4294967040  ;;  %s16_s17 = sadd.s32 1, %s609_s17   ;;  %s786_s12 = smov %s593_s13 }
 0x100   : > { %p13_p3 = scmp.ge.s32.totalorder %s16_s17, 4   ;;  %s787_s13 = smov %s597_s14 }
 0x101   : > { %s788_s14 = smov %s687_s25  ;;  %s789_s15 = smov %s605_s16 }
 0x102   : > { %s790_s16 = smov %s792_s20  ;;  %15 = sbr.rel (!%p13_p3) target bundleno = 4 (0x4), region = 70 }
 0x107   :  { %356 = vsyncpa [#allocation3], 1 }
 0x108   :  { %358 = vsyncpa [#allocation3 + $0x1], 1 }

</bundles_post_ra>
